<compile_context>
chip_gen: v7x
topology: tpu7x:2x2x1
jax: 0.10.0
libtpu: 0.0.40
codegen_flags: <defaults>
</compile_context>

<pallas_src>
import jax
import jax.numpy as jnp
from jax.experimental import pallas as pl
from jax.experimental.pallas import tpu as pltpu

# ---------------- model hyper-parameters (small, synthetic) ----------------
B = 2          # batch
L = 8          # sequence length (max_length)
D = 32         # args.bert_feature_dim
H = 16         # args.biaffine_size
C = 4          # Biaffine out_features == args.class_num
NER = 5        # ner_layer out features
VOCAB = 50     # synthetic vocab for the stand-in embedding

BL = B * L                    # 16 tokens total
HA = H + 1                    # augmented bilinear width (bias column folded in)
EOFF, NOFF, TOFF = 0, HA, HA + NER
NW = HA + NER + C * HA        # 17 + 5 + 68 = 90 fused mega-matmul lanes
OUT_W = L * C                 # 32 output lanes, (j, c)-interleaved


# ---------------------------- Pallas kernel ---------------------------------
def fused_kernel(ids_ref, mcol_ref, mrow_ref, emb_ref, wmega_ref, bmega_ref,
                 tri_ref, q_ref, bia_ref, ner_ref):
    f32 = jnp.float32

    # --- BERT stand-in: embedding lookup as a one-hot matmul (MXU friendly) --
    ids = ids_ref[...]                                             # [BL, 1] i32
    vocab_iota = jax.lax.broadcasted_iota(jnp.int32, (BL, VOCAB), 1)
    onehot = (ids == vocab_iota).astype(f32)                       # [BL, VOCAB]
    x = jnp.dot(onehot, emb_ref[...], preferred_element_type=f32)  # [BL, D]
    # dropout_output(p=0.1) -- eval mode: identity

    # --- ONE mega matmul: [end_aug | ner | biaffine stage-1 (T_aug)] ---------
    feat = jnp.dot(x, wmega_ref[...], preferred_element_type=f32) + bmega_ref[...]

    end_aug = feat[:, EOFF:EOFF + HA]                              # [BL, H+1]
    ner_ref[...] = feat[:, NOFF:NOFF + NER]                        # single store

    # --- mask, hoisted & built ONCE for the whole batch ----------------------
    #   bigmask[ii, jj] = m[ii] * m[jj] * (same batch block) * triu(j >= i)
    # It both applies the module's mask and zeroes cross-batch products, which
    # lets stage 2 run on the flat [BL] token axis with no per-batch loop.
    bigmask = mcol_ref[...] * mrow_ref[...] * tri_ref[...]         # [BL, BL]

    q_all = q_ref[...]                                             # [C*BL, L*C]

    # --- biaffine stage 2: C independent MXU contractions, no transposes,
    #     no concat, no perm matrix, no per-batch work -------------------------
    acc = None
    for c in range(C):                                             # C = 4, static
        t_c = feat[:, TOFF + c * HA: TOFF + (c + 1) * HA]          # [BL, H+1]
        # contract dim 1 of both operands: the "transpose" of end happens in
        # the MXU operand load, not as an XLU vxpose.
        s_c = jax.lax.dot_general(t_c, end_aug,
                                  (((1,), (1,)), ((), ())),
                                  preferred_element_type=f32)      # [BL, BL]
        # constant matmul = batch-block compaction + (j, c) lane interleave
        contrib = jnp.dot(s_c * bigmask, q_all[c * BL:(c + 1) * BL],
                          preferred_element_type=f32)              # [BL, L*C]
        acc = contrib if c == 0 else acc + contrib

    bia_ref[...] = acc                                             # ONE [16,32] store


# ------------------------------ wrapper --------------------------------------
def _full_spec(shape):
    zeros = (0,) * len(shape)
    return pl.BlockSpec(shape, lambda i: zeros)


def biaffine_model_forward(input_ids, attention_mask, prep):
    ids2 = input_ids.reshape(BL, 1).astype(jnp.int32)
    mask = attention_mask[:, :L].astype(jnp.float32)               # [B, L]
    mcol = mask.reshape(BL, 1)                                     # row factor
    mrow = mask.reshape(1, BL)                                     # col factor

    in_arrays = (ids2, mcol, mrow, prep["emb"], prep["w_mega"], prep["b_mega"],
                 prep["tri_block"], prep["q_all"])

    bia_flat, ner_flat = pl.pallas_call(
        fused_kernel,
        grid=(1,),
        in_specs=[_full_spec(a.shape) for a in in_arrays],
        out_specs=[_full_spec((BL, OUT_W)), _full_spec((BL, NER))],
        out_shape=[jax.ShapeDtypeStruct((BL, OUT_W), jnp.float32),
                   jax.ShapeDtypeStruct((BL, NER), jnp.float32)],
        compiler_params=pltpu.CompilerParams(dimension_semantics=("arbitrary",)),
    )(*in_arrays)

    # Row-major-preserving reshapes: compiled to bitcasts (no data movement).
    return bia_flat.reshape(B, L, L, C), ner_flat.reshape(B, L, NER)


# ---------------------- one-time weight folding / packing --------------------
def prepare_params(p):
    """Fold/pack weights (runs once on weights, never on activations)."""
    f32 = jnp.float32
    u = p["u"]                                                     # [C, H+1, H+1]

    # NER two-layer head folded into one matmul (the PyTorch source has NO
    # nonlinearity / dropout between ner_hidden_layer and ner_layer).
    wner_eff = p["wnh"] @ p["wner"]                                # [D, NER]
    bner_eff = p["bnh"] @ p["wner"] + p["bner"]                    # [1, NER]

    # end head with a literal ones column appended (e_aug bias realized as
    # zero weights + bias 1, so it costs nothing in-kernel).
    w_end_aug = jnp.concatenate([p["we"], jnp.zeros((D, 1), f32)], axis=1)
    b_end_aug = jnp.concatenate([p["be"], jnp.ones((1, 1), f32)], axis=1)

    # Biaffine stage-1 folded THROUGH the start head onto the bert features:
    #   T_aug[:, c*(H+1)+q] = x @ (ws @ U[c,:H,q]) + (bs @ U[c,:H,q] + U[c,H,q])
    # The q == H column carries the "R" bias term of the bilinear; it pairs
    # with the ones column of end_aug so the whole bilinear (both bias paths
    # included) is one contraction of width H+1.
    u_t = u[:, :H, :]                                              # [C, H, H+1]
    w_t = jnp.einsum("dh,chq->dcq", p["ws"], u_t).reshape(D, C * HA)
    b_t = (jnp.einsum("oh,chq->ocq", p["bs"], u_t)
           + u[:, H, :][None]).reshape(1, C * HA)

    w_mega = jnp.concatenate([w_end_aug, wner_eff, w_t], axis=1)   # [D, NW]
    b_mega = jnp.concatenate([b_end_aug, bner_eff, b_t], axis=1)   # [1, NW]
    # (kept f32 for exactness of the check; at real sizes pack these in bf16)

    # --- constant masks / compaction matrices (data-independent) -------------
    ii = jnp.arange(BL)
    same_b = (ii[:, None] // L) == (ii[None, :] // L)              # batch-block diag
    tri_block = (same_b & (ii[None, :] >= ii[:, None])).astype(f32)  # [BL, BL]

    # q_all[c*BL + jj, j*C + c'] = (c == c') * (jj mod L == j):
    # one constant 0/1 matrix that compacts over batch blocks AND places the
    # result in PyTorch (j, c)-interleaved lane order.
    rows = jnp.arange(C * BL)
    cols = jnp.arange(L * C)
    q_all = (((rows // BL)[:, None] == (cols % C)[None, :])
             & ((rows % L)[:, None] == (cols // C)[None, :])).astype(f32)

    return dict(emb=p["emb"], w_mega=w_mega, b_mega=b_mega,
                tri_block=tri_block, q_all=q_all)


# ------------------------- pure-JAX reference --------------------------------
def reference_forward(input_ids, attention_mask, p):
    x = p["emb"][input_ids]
    start = x @ p["ws"] + p["bs"]
    end = x @ p["we"] + p["be"]
    ner = (x @ p["wnh"] + p["bnh"]) @ p["wner"] + p["bner"]
    ones = jnp.ones((B, L, 1), jnp.float32)
    s_aug = jnp.concatenate([start, ones], -1)
    e_aug = jnp.concatenate([end, ones], -1)
    bia = jnp.einsum("bip,cpq,bjq->bijc", s_aug, p["u"], e_aug)
    m = attention_mask[:, :L].astype(jnp.float32)
    m2 = m[:, :, None] * m[:, None, :]
    tri = jnp.triu(jnp.ones((L, L), jnp.float32))
    return bia * (m2 * tri)[..., None], ner


# ------------------------------- params --------------------------------------
def make_params(key):
    ks = jax.random.split(key, 10)
    s = 0.05
    return dict(
        ws=jax.random.normal(ks[0], (D, H), jnp.float32) * s,        # start.weight^T
        bs=jax.random.normal(ks[1], (1, H), jnp.float32) * s,        # start.bias
        we=jax.random.normal(ks[2], (D, H), jnp.float32) * s,        # end.weight^T
        be=jax.random.normal(ks[3], (1, H), jnp.float32) * s,        # end.bias
        wnh=jax.random.normal(ks[4], (D, D), jnp.float32) * s,       # ner_hidden^T
        bnh=jax.random.normal(ks[5], (1, D), jnp.float32) * s,
        wner=jax.random.normal(ks[6], (D, NER), jnp.float32) * s,    # ner_layer^T
        bner=jax.random.normal(ks[7], (1, NER), jnp.float32) * s,
        # Biaffine linear weight reshaped/permuted to U[c, p, q] ((H+1)x(H+1))
        u=jax.random.normal(ks[8], (C, H + 1, H + 1), jnp.float32) * s,
        emb=jax.random.normal(ks[9], (VOCAB, D), jnp.float32) * s,   # BERT stand-in
    )


if __name__ == "__main__":
    key = jax.random.PRNGKey(0)
    kp, ki = jax.random.split(key)
    params = make_params(kp)
    prep = prepare_params(params)

    input_ids = jax.random.randint(ki, (B, L), 0, VOCAB, dtype=jnp.int32)
    attention_mask = jnp.array(
        [[1, 1, 1, 1, 1, 1, 1, 1],
         [1, 1, 1, 1, 1, 0, 0, 0]], dtype=jnp.float32)

    fwd = jax.jit(biaffine_model_forward)
    bia, ner = fwd(input_ids, attention_mask, prep)
    jax.block_until_ready((bia, ner))

    bia_ref, ner_ref = reference_forward(input_ids, attention_mask, params)
    assert bia.shape == (B, L, L, C) and ner.shape == (B, L, NER)
    assert jnp.allclose(bia, bia_ref, atol=1e-5, rtol=1e-5)
    assert jnp.allclose(ner, ner_ref, atol=1e-5, rtol=1e-5)

    print("KERNEL_OK")
</pallas_src>

<mosaic_0001>
module attributes {stable_mosaic.version = 11 : i64} {
  func.func @fused_kernel(%arg0: i32, %arg1: memref<16x1xi32, #tpu.memory_space<vmem>>, %arg2: memref<16x1xf32, #tpu.memory_space<vmem>>, %arg3: memref<1x16xf32, #tpu.memory_space<vmem>>, %arg4: memref<50x32xf32, #tpu.memory_space<vmem>>, %arg5: memref<32x90xf32, #tpu.memory_space<vmem>>, %arg6: memref<1x90xf32, #tpu.memory_space<vmem>>, %arg7: memref<16x16xf32, #tpu.memory_space<vmem>>, %arg8: memref<64x32xf32, #tpu.memory_space<vmem>>, %arg9: memref<16x32xf32, #tpu.memory_space<vmem>>, %arg10: memref<16x5xf32, #tpu.memory_space<vmem>>) attributes {dimension_semantics = [#tpu.dimension_semantics<arbitrary>], iteration_bounds = array<i64: 1>, scalar_prefetch = 0 : i64, scratch_operands = 0 : i64, tpu.core_type = #tpu.core_type<tc>, window_params = [{pipeline_mode = #tpu.pipeline_mode<synchronous>, transform_indices = @transform_0, window_bounds = array<i64: 16, 1>}, {pipeline_mode = #tpu.pipeline_mode<synchronous>, transform_indices = @transform_1, window_bounds = array<i64: 16, 1>}, {pipeline_mode = #tpu.pipeline_mode<synchronous>, transform_indices = @transform_2, window_bounds = array<i64: 1, 16>}, {pipeline_mode = #tpu.pipeline_mode<synchronous>, transform_indices = @transform_3, window_bounds = array<i64: 50, 32>}, {pipeline_mode = #tpu.pipeline_mode<synchronous>, transform_indices = @transform_4, window_bounds = array<i64: 32, 90>}, {pipeline_mode = #tpu.pipeline_mode<synchronous>, transform_indices = @transform_5, window_bounds = array<i64: 1, 90>}, {pipeline_mode = #tpu.pipeline_mode<synchronous>, transform_indices = @transform_6, window_bounds = array<i64: 16, 16>}, {pipeline_mode = #tpu.pipeline_mode<synchronous>, transform_indices = @transform_7, window_bounds = array<i64: 64, 32>}, {pipeline_mode = #tpu.pipeline_mode<synchronous>, transform_indices = @transform_8, window_bounds = array<i64: 16, 32>}, {pipeline_mode = #tpu.pipeline_mode<synchronous>, transform_indices = @transform_9, window_bounds = array<i64: 16, 5>}]} {
    %c0 = arith.constant 0 : index
    %c0_0 = arith.constant 0 : index
    %0 = vector.load %arg1[%c0, %c0_0] : memref<16x1xi32, #tpu.memory_space<vmem>>, vector<16x1xi32>
    %1 = tpu.iota {dimensions = array<i32: 1>} : vector<16x50xi32>
    %2 = vector.broadcast %0 : vector<16x1xi32> to vector<16x50xi32>
    %3 = arith.cmpi eq, %2, %1 : vector<16x50xi32>
    %4 = arith.extui %3 : vector<16x50xi1> to vector<16x50xi32>
    %5 = arith.sitofp %4 : vector<16x50xi32> to vector<16x50xf32>
    %c0_1 = arith.constant 0 : index
    %c0_2 = arith.constant 0 : index
    %6 = vector.load %arg4[%c0_1, %c0_2] : memref<50x32xf32, #tpu.memory_space<vmem>>, vector<50x32xf32>
    %cst = arith.constant dense<0.000000e+00> : vector<16x32xf32>
    %7 = tpu.matmul %5, %6, %cst {dimension_numbers = #tpu.dot_dimension_numbers<[1], [0], [0], [1], [0, 0, 1, 1], [], []>} : vector<16x50xf32>, vector<50x32xf32>, vector<16x32xf32> -> vector<16x32xf32>
    %c0_3 = arith.constant 0 : index
    %c0_4 = arith.constant 0 : index
    %8 = vector.load %arg5[%c0_3, %c0_4] : memref<32x90xf32, #tpu.memory_space<vmem>>, vector<32x90xf32>
    %cst_5 = arith.constant dense<0.000000e+00> : vector<16x90xf32>
    %9 = tpu.matmul %7, %8, %cst_5 {dimension_numbers = #tpu.dot_dimension_numbers<[1], [0], [0], [1], [0, 0, 1, 1], [], []>} : vector<16x32xf32>, vector<32x90xf32>, vector<16x90xf32> -> vector<16x90xf32>
    %c0_6 = arith.constant 0 : index
    %c0_7 = arith.constant 0 : index
    %10 = vector.load %arg6[%c0_6, %c0_7] : memref<1x90xf32, #tpu.memory_space<vmem>>, vector<1x90xf32>
    %11 = vector.broadcast %10 : vector<1x90xf32> to vector<16x90xf32>
    %12 = arith.addf %9, %11 : vector<16x90xf32>
    %13 = vector.extract_strided_slice %12 {offsets = [0, 0], sizes = [16, 17], strides = [1, 1]} : vector<16x90xf32> to vector<16x17xf32>
    %14 = vector.extract_strided_slice %12 {offsets = [0, 17], sizes = [16, 5], strides = [1, 1]} : vector<16x90xf32> to vector<16x5xf32>
    %c0_8 = arith.constant 0 : index
    %c0_9 = arith.constant 0 : index
    %15 = vector.load %arg10[%c0_8, %c0_9] : memref<16x5xf32, #tpu.memory_space<vmem>>, vector<16x5xf32>
    tpu.vector_store %arg10[%c0_8, %c0_9], %14 {strides = array<i32>} : memref<16x5xf32, #tpu.memory_space<vmem>>, vector<16x5xf32>,
    %c0_10 = arith.constant 0 : index
    %c0_11 = arith.constant 0 : index
    %16 = vector.load %arg2[%c0_10, %c0_11] : memref<16x1xf32, #tpu.memory_space<vmem>>, vector<16x1xf32>
    %c0_12 = arith.constant 0 : index
    %c0_13 = arith.constant 0 : index
    %17 = vector.load %arg3[%c0_12, %c0_13] : memref<1x16xf32, #tpu.memory_space<vmem>>, vector<1x16xf32>
    %18 = vector.broadcast %16 : vector<16x1xf32> to vector<16x16xf32>
    %19 = vector.broadcast %17 : vector<1x16xf32> to vector<16x16xf32>
    %20 = arith.mulf %18, %19 : vector<16x16xf32>
    %c0_14 = arith.constant 0 : index
    %c0_15 = arith.constant 0 : index
    %21 = vector.load %arg7[%c0_14, %c0_15] : memref<16x16xf32, #tpu.memory_space<vmem>>, vector<16x16xf32>
    %22 = arith.mulf %20, %21 : vector<16x16xf32>
    %c0_16 = arith.constant 0 : index
    %c0_17 = arith.constant 0 : index
    %23 = vector.load %arg8[%c0_16, %c0_17] : memref<64x32xf32, #tpu.memory_space<vmem>>, vector<64x32xf32>
    %24 = vector.extract_strided_slice %12 {offsets = [0, 22], sizes = [16, 17], strides = [1, 1]} : vector<16x90xf32> to vector<16x17xf32>
    %cst_18 = arith.constant dense<0.000000e+00> : vector<16x16xf32>
    %25 = tpu.matmul %24, %13, %cst_18 {dimension_numbers = #tpu.dot_dimension_numbers<[1], [1], [0], [0], [0, 0, 1, 0], [], []>} : vector<16x17xf32>, vector<16x17xf32>, vector<16x16xf32> -> vector<16x16xf32>
    %26 = arith.mulf %25, %22 : vector<16x16xf32>
    %27 = vector.extract_strided_slice %23 {offsets = [0, 0], sizes = [16, 32], strides = [1, 1]} : vector<64x32xf32> to vector<16x32xf32>
    %cst_19 = arith.constant dense<0.000000e+00> : vector<16x32xf32>
    %28 = tpu.matmul %26, %27, %cst_19 {dimension_numbers = #tpu.dot_dimension_numbers<[1], [0], [0], [1], [0, 0, 1, 1], [], []>} : vector<16x16xf32>, vector<16x32xf32>, vector<16x32xf32> -> vector<16x32xf32>
    %29 = vector.extract_strided_slice %12 {offsets = [0, 39], sizes = [16, 17], strides = [1, 1]} : vector<16x90xf32> to vector<16x17xf32>
    %cst_20 = arith.constant dense<0.000000e+00> : vector<16x16xf32>
    %30 = tpu.matmul %29, %13, %cst_20 {dimension_numbers = #tpu.dot_dimension_numbers<[1], [1], [0], [0], [0, 0, 1, 0], [], []>} : vector<16x17xf32>, vector<16x17xf32>, vector<16x16xf32> -> vector<16x16xf32>
    %31 = arith.mulf %30, %22 : vector<16x16xf32>
    %32 = vector.extract_strided_slice %23 {offsets = [16, 0], sizes = [16, 32], strides = [1, 1]} : vector<64x32xf32> to vector<16x32xf32>
    %cst_21 = arith.constant dense<0.000000e+00> : vector<16x32xf32>
    %33 = tpu.matmul %31, %32, %cst_21 {dimension_numbers = #tpu.dot_dimension_numbers<[1], [0], [0], [1], [0, 0, 1, 1], [], []>} : vector<16x16xf32>, vector<16x32xf32>, vector<16x32xf32> -> vector<16x32xf32>
    %34 = arith.addf %28, %33 : vector<16x32xf32>
    %35 = vector.extract_strided_slice %12 {offsets = [0, 56], sizes = [16, 17], strides = [1, 1]} : vector<16x90xf32> to vector<16x17xf32>
    %cst_22 = arith.constant dense<0.000000e+00> : vector<16x16xf32>
    %36 = tpu.matmul %35, %13, %cst_22 {dimension_numbers = #tpu.dot_dimension_numbers<[1], [1], [0], [0], [0, 0, 1, 0], [], []>} : vector<16x17xf32>, vector<16x17xf32>, vector<16x16xf32> -> vector<16x16xf32>
    %37 = arith.mulf %36, %22 : vector<16x16xf32>
    %38 = vector.extract_strided_slice %23 {offsets = [32, 0], sizes = [16, 32], strides = [1, 1]} : vector<64x32xf32> to vector<16x32xf32>
    %cst_23 = arith.constant dense<0.000000e+00> : vector<16x32xf32>
    %39 = tpu.matmul %37, %38, %cst_23 {dimension_numbers = #tpu.dot_dimension_numbers<[1], [0], [0], [1], [0, 0, 1, 1], [], []>} : vector<16x16xf32>, vector<16x32xf32>, vector<16x32xf32> -> vector<16x32xf32>
    %40 = arith.addf %34, %39 : vector<16x32xf32>
    %41 = vector.extract_strided_slice %12 {offsets = [0, 73], sizes = [16, 17], strides = [1, 1]} : vector<16x90xf32> to vector<16x17xf32>
    %cst_24 = arith.constant dense<0.000000e+00> : vector<16x16xf32>
    %42 = tpu.matmul %41, %13, %cst_24 {dimension_numbers = #tpu.dot_dimension_numbers<[1], [1], [0], [0], [0, 0, 1, 0], [], []>} : vector<16x17xf32>, vector<16x17xf32>, vector<16x16xf32> -> vector<16x16xf32>
    %43 = arith.mulf %42, %22 : vector<16x16xf32>
    %44 = vector.extract_strided_slice %23 {offsets = [48, 0], sizes = [16, 32], strides = [1, 1]} : vector<64x32xf32> to vector<16x32xf32>
    %cst_25 = arith.constant dense<0.000000e+00> : vector<16x32xf32>
    %45 = tpu.matmul %43, %44, %cst_25 {dimension_numbers = #tpu.dot_dimension_numbers<[1], [0], [0], [1], [0, 0, 1, 1], [], []>} : vector<16x16xf32>, vector<16x32xf32>, vector<16x32xf32> -> vector<16x32xf32>
    %46 = arith.addf %40, %45 : vector<16x32xf32>
    %c0_26 = arith.constant 0 : index
    %c0_27 = arith.constant 0 : index
    %47 = vector.load %arg9[%c0_26, %c0_27] : memref<16x32xf32, #tpu.memory_space<vmem>>, vector<16x32xf32>
    tpu.vector_store %arg9[%c0_26, %c0_27], %46 {strides = array<i32>} : memref<16x32xf32, #tpu.memory_space<vmem>>, vector<16x32xf32>,
    return
  }
  func.func @transform_0(%arg0: i32) -> (i32, i32) {
    %c0_i32 = arith.constant 0 : i32
    %c0_i32_0 = arith.constant 0 : i32
    %c0_i32_1 = arith.constant 0 : i32
    return %c0_i32, %c0_i32_0 : i32, i32
  }
  func.func @transform_1(%arg0: i32) -> (i32, i32) {
    %c0_i32 = arith.constant 0 : i32
    %c0_i32_0 = arith.constant 0 : i32
    %c0_i32_1 = arith.constant 0 : i32
    return %c0_i32, %c0_i32_0 : i32, i32
  }
  func.func @transform_2(%arg0: i32) -> (i32, i32) {
    %c0_i32 = arith.constant 0 : i32
    %c0_i32_0 = arith.constant 0 : i32
    %c0_i32_1 = arith.constant 0 : i32
    return %c0_i32, %c0_i32_0 : i32, i32
  }
  func.func @transform_3(%arg0: i32) -> (i32, i32) {
    %c0_i32 = arith.constant 0 : i32
    %c0_i32_0 = arith.constant 0 : i32
    %c0_i32_1 = arith.constant 0 : i32
    return %c0_i32, %c0_i32_0 : i32, i32
  }
  func.func @transform_4(%arg0: i32) -> (i32, i32) {
    %c0_i32 = arith.constant 0 : i32
    %c0_i32_0 = arith.constant 0 : i32
    %c0_i32_1 = arith.constant 0 : i32
    return %c0_i32, %c0_i32_0 : i32, i32
  }
  func.func @transform_5(%arg0: i32) -> (i32, i32) {
    %c0_i32 = arith.constant 0 : i32
    %c0_i32_0 = arith.constant 0 : i32
    %c0_i32_1 = arith.constant 0 : i32
    return %c0_i32, %c0_i32_0 : i32, i32
  }
  func.func @transform_6(%arg0: i32) -> (i32, i32) {
    %c0_i32 = arith.constant 0 : i32
    %c0_i32_0 = arith.constant 0 : i32
    %c0_i32_1 = arith.constant 0 : i32
    return %c0_i32, %c0_i32_0 : i32, i32
  }
  func.func @transform_7(%arg0: i32) -> (i32, i32) {
    %c0_i32 = arith.constant 0 : i32
    %c0_i32_0 = arith.constant 0 : i32
    %c0_i32_1 = arith.constant 0 : i32
    return %c0_i32, %c0_i32_0 : i32, i32
  }
  func.func @transform_8(%arg0: i32) -> (i32, i32) {
    %c0_i32 = arith.constant 0 : i32
    %c0_i32_0 = arith.constant 0 : i32
    %c0_i32_1 = arith.constant 0 : i32
    return %c0_i32, %c0_i32_0 : i32, i32
  }
  func.func @transform_9(%arg0: i32) -> (i32, i32) {
    %c0_i32 = arith.constant 0 : i32
    %c0_i32_0 = arith.constant 0 : i32
    %c0_i32_1 = arith.constant 0 : i32
    return %c0_i32, %c0_i32_0 : i32, i32
  }
}

</mosaic_0001>

<bundles_post_ra>
// kernel: biaffine_model_forward.1
= control target key start
LH: loop header
LB: loop body
LE: loop exit
PB: predicated region body
PF: predicated region fallthrough
CT: control target
= control target key end

     0   :  { %v1200_v0 = vmov 0   ;;  %vm61_vm0 = vcmask 1041408   ;;  %v33_v20 = vlaneseq  ;;  %vm54_vm1 = vcmask 408576   ;;  %s1203_s19 = smov 89   ;;  %s1204_s20 = smov 72   ;;  %s1402_s0 = inlined_call_operand.vmem [shape: s32[16,1], index: 0, kind: input, shape index: {}]   ;;  %s1403_s3 = inlined_call_operand.vmem [shape: f32[50,32], index: 3, kind: input, shape index: {}]   ;;  %s1404_s1 = inlined_call_operand.vmem [shape: f32[16,1], index: 1, kind: input, shape index: {}]   ;;  %s1405_s4 = inlined_call_operand.vmem [shape: f32[32,90], index: 4, kind: input, shape index: {}]   ;;  %s1406_s5 = inlined_call_operand.vmem [shape: f32[1,90], index: 5, kind: input, shape index: {}]   ;;  %s1407_s7 = inlined_call_operand.vmem [shape: f32[64,32], index: 7, kind: input, shape index: {}]   ;;  %s1408_s9 = inlined_call_operand.vmem [shape: f32[16,5], index: 9, kind: output, shape index: {1}]   ;;  %s1409_s2 = inlined_call_operand.vmem [shape: f32[1,16], index: 2, kind: input, shape index: {}]   ;;  %s1410_s6 = inlined_call_operand.vmem [shape: f32[16,16], index: 6, kind: input, shape index: {}]   ;;  %s1411_s8 = inlined_call_operand.vmem [shape: f32[16,32], index: 8, kind: output, shape index: {0}]  }
   0x1   :  { %1198 = vset.pattern.permute.xlu0 %v1200_v0  ;;  %v31_v1 = vld [vmem:[%s1402_s0] sm:$0xff]  ;;  %1199 = vset.pattern.permute.xlu1 %v1200_v0  ;;  %v48_v3 = vld [vmem:[%s1403_s3 + $0x8] sm:$0xff]  ;;  %v49_v4 = vld [vmem:[%s1403_s3 + $0x10] sm:$0xff]  ;;  %v1201_v23 = vmov 0.0   ;;  %vm151_vm4 = vcmask 261120   ;;  %vm281_vm5 = vcmask 138240  }
   0x2   :  { %36 = vperm.xlu0 %1198, %v31_v1   ;;  %v47_v2 = vld [vmem:[%s1403_s3] sm:$0xff]  ;;  %v32_v5 = vld [vmem:[%s1402_s0 + $0x8] sm:$0xff]  ;;  %v50_v7 = vld [vmem:[%s1403_s3 + $0x18] sm:$0xff]  ;;  %v34_v21 = vand.u32 127, %v33_v20  ;;  %s1205_s23 = smov 55   ;;  %s1206_s24 = smov 111  }
   0x3   :  { %v1125_v6 = vpack.c.bf16 %v48_v3, %v47_v2  ;;  %v1129_v8 = vpack.c.bf16 %v50_v7, %v49_v4  ;;  %v51_v9 = vld [vmem:[%s1403_s3 + $0x20] sm:$0xff]  ;;  %v52_v10 = vld [vmem:[%s1403_s3 + $0x28] sm:$0xff]  ;;  %v53_v13 = vld [vmem:[%s1403_s3 + $0x30] sm:$0x3]  ;;  %vm241_vm7 = vcmask 39936   ;;  %vm452_vm8 = vcmask 130048  }
   0x4   :  { %v244_v11 = vld [vmem:[%s1404_s1] sm:$0xff]  ;;  %v1133_v12 = vpack.c.bf16 %v52_v10, %v51_v9  ;;  %v141_v15 = vld [vmem:[%s1405_s4 + $0x8] sm:$0xff]  ;;  %v142_v16 = vld [vmem:[%s1405_s4 + $0x10] sm:$0xff] }
   0x5   :  { %1126 = vmatprep.subr.bf16.mxu0 %v1125_v6  ;;  %v140_v14 = vld [vmem:[%s1405_s4] sm:$0xff]  ;;  %v143_v18 = vld [vmem:[%s1405_s4 + $0x18] sm:$0xff]  ;;  %v271_v34 = vld [vmem:[%s1407_s7 + $0x10] sm:$0xff] }
   0x6   :  { %39 = vperm.xlu0 %1198, %v32_v5   ;;  %1128 = vmatpush3.bf16.msra.mxu0 %v1125_v6  ;;  %v1137_v17 = vpack.c.bf16 %v141_v15, %v140_v14  ;;  %v1141_v19 = vpack.c.bf16 %v143_v18, %v142_v16  ;;  %v966_v29 = vld [vmem:[%s1406_s5] ss:$0 sm:$0xff]  ;;  %v272_v35 = vld [vmem:[%s1407_s7 + $0x18] sm:$0xff]  ;;  %vm1312_vm6 = vmpackc.low %vm281_vm5, %vm281_vm5  ;;  %s1202_s5 = smov 106  }
   0x7   :  { %1130 = vmatprep.subr.bf16.mxu0 %v1129_v8  ;;  %v1157_v38 = vpack.c.bf16 %v272_v35, %v271_v34  ;;  %v245_v39 = vld [vmem:[%s1404_s1 + $0x8] sm:$0xff]  ;;  %v269_v52 = vld [vmem:[%s1407_s7] sm:$0xff]  ;;  %v275_v15 = vld [vmem:[%s1407_s7 + $0x30] sm:$0xff] }
   0x8   :  { %1138 = vmatprep.subr.bf16.mxu1 %v1137_v17  ;;  %v270_v53 = vld [vmem:[%s1407_s7 + $0x8] sm:$0xff]  ;;  %v273_v55 = vld [vmem:[%s1407_s7 + $0x20] sm:$0xff]  ;;  %v276_v16 = vld [vmem:[%s1407_s7 + $0x38] sm:$0xff] }
   0x9   :  { %1140 = vmatpush3.bf16.msra.mxu1 %v1137_v17  ;;  %v1161_v54 = vpack.c.bf16 %v270_v53, %v269_v52  ;;  %v274_v56 = vld [vmem:[%s1407_s7 + $0x28] sm:$0xff]  ;;  %v969_v58 = vld [vmem:[%s1409_s2] ss:$0 sm:$0xff]  ;;  %v1181_v17 = vpack.c.bf16 %v276_v16, %v275_v15 }
   0xa   :  { %249 = vperm.xlu0 %1198, %v244_v11   ;;  %1132 = vmatpush3.bf16.msra.mxu0 %v1129_v8  ;;  %v1171_v57 = vpack.c.bf16 %v274_v56, %v273_v55  ;;  %v266_v61 = vld [vmem:[%s1410_s6 + $0x8] sm:$0xff]  ;;  %v265_v62 = vld [vmem:[%s1410_s6] sm:$0xff] }
   0xb   :  { %1134 = vmatprep.subr.bf16.mxu0 %v1133_v12  ;;  %1142 = vmatprep.subr.bf16.mxu1 %v1141_v19 }
   0xd   :  { %1144 = vmatpush3.bf16.msra.mxu1 %v1141_v19 }
   0xe   :  { %1136 = vmatpush3.bf16.msra.mxu0 %v1133_v12 }
   0xf   :  { %1053 = vmatprep.subr.msk.mxu0 %vm61_vm0, %v53_v13 }
  0x12   :  { %1054 = vmatpush3.msk.msra.mxu0 %vm61_vm0, %v53_v13 }
  0x81   :  { %v37_v22 = vpop.permute.xlu0 %36 }
  0x82   :  { %vm41_vm2 = vcmp.eq.s32.totalorder %v37_v22, %v34_v21 }
  0x83   :  { %v961_v24 = vsel %vm41_vm2, 1.0, %v1201_v23 }
  0x84   :  { %1055 = vmatprep.mubr.msk.f32.mxu0 %vm54_vm1, %v961_v24 }
  0x85   :  { %v40_v25 = vpop.permute.xlu0 %39 }
  0x86   :  { %vm42_vm3 = vcmp.eq.s32.totalorder %v40_v25, %v34_v21 }
  0x87   :  { %v962_v26 = vsel %vm42_vm3, 1.0, %v1201_v23 }
  0x88   :  { %1056 = vmatmul.mubr.msk.f32.vlgmr.msra.gmra.mrb[0].mxu0 %vm54_vm1, %v962_v26 }
  0x89   :  { %v250_v40 = vpop.permute.xlu0 %249 }
  0x8a   :  { %v263_v60 = vmul.f32 %v969_v58, %v250_v40 }
  0x8c   :  { %v267_v0 = vmul.f32 %v265_v62, %v263_v60 }
 0x15b   :  { %v1057_v27 = vpop.f32.mrb[0].mxu0 }
 0x15c   :  { %v131_v28 = vpop.f32.mrb[1].mxu0 }
 0x15d   :  { %1066 = vmatprep.mubr.msk.f32.mxu1 %vm151_vm4, %v131_v28 }
 0x15e   :  { %1067 = vmatmul.mubr.msk.f32.vlgmr.msra.gmra.mrb[0].mxu1 %vm151_vm4, %v1057_v27 }
 0x231   :  { %v1068_v30 = vpop.f32.mrb[0].mxu1 }
 0x232   :  { %v230_v31 = vadd.f32 %v1068_v30, %v966_v29  ;;  %v224_v32 = vpop.f32.mrb[1].mxu1 }
 0x233   :  { %v225_v33 = vadd.f32 %v966_v29, %v224_v32 }
 0x235   :  { %v1316_v37 = vpack.c.bf16 %v230_v31, %v225_v33  ;;  %277 = vrot.lane.b32.xlu0 %v225_v33, %s1202_s5  ;;  %367 = vrot.lane.b32.xlu1 %v225_v33, %s1203_s19 }
 0x237   :  { %1147 = vmatprep.subr.msk.bf16.mxu1 %vm1312_vm6, %v1316_v37  ;;  %1153 = vmatprep.subr.msk.bf16.mxu0 %vm1312_vm6, %v1316_v37 }
 0x238   :  { %1150 = vmatpush3.bf16.xpose.msk.msra.mxu1 %vm1312_vm6, %v1316_v37  ;;  %1156 = vmatpush3.bf16.xpose.msk.msra.mxu0 %vm1312_vm6, %v1316_v37 }
 0x239   :  { %615 = vrot.lane.b32.xlu0 %v225_v33, %s1204_s20  ;;  %369 = vrot.lane.b32.xlu1 %v230_v31, %s1203_s19 }
 0x23a   :  { %1158 = vmatprep.subr.bf16.mxu0 %v1157_v38  ;;  %1162 = vmatprep.subr.bf16.mxu1 %v1161_v54 }
 0x23d   :  { %783 = vrot.lane.b32.xlu0 %v225_v33, %s1205_s23  ;;  %254 = vperm.xlu1 %1199, %v245_v39  }
 0x241   :  { %235 = vrot.lane.b32.xlu0 %v225_v33, %s1206_s24  ;;  %279 = vrot.lane.b32.xlu1 %v230_v31, %s1202_s5 }
 0x245   :  { %617 = vrot.lane.b32.xlu1 %v230_v31, %s1204_s20 }
 0x249   :  { %785 = vrot.lane.b32.xlu1 %v230_v31, %s1205_s23 }
 0x24d   :  { %237 = vrot.lane.b32.xlu1 %v230_v31, %s1206_s24 }
 0x2a7   :  { %v368_v41 = vpop.permute.xlu1 %367  ;;  %v278_v42 = vpop.permute.xlu0 %277 }
 0x2a8   :  { %1073 = vmatprep.mubr.msk.f32.mxu1 %vm281_vm5, %v278_v42  ;;  %1080 = vmatprep.mubr.msk.f32.mxu0 %vm281_vm5, %v368_v41 }
 0x2ab   :  { %v370_v43 = vpop.permute.xlu1 %369  ;;  %v616_v44 = vpop.permute.xlu0 %615 }
 0x2ac   :  { %1081 = vmatmul.mubr.msk.f32.vlgmr.msra.gmra.mrb[2].mxu0 %vm281_vm5, %v370_v43 }
 0x2ad   :  { %1160 = vmatpush3.bf16.msra.mxu0 %v1157_v38 }
 0x2ae   :  { %1167 = vmatprep.subr.msk.bf16.mxu0 %vm1312_vm6, %v1316_v37 }
 0x2af   :  { %v784_v45 = vpop.permute.xlu0 %783 }
 0x2b3   :  { %v236_v46 = vpop.permute.xlu0 %235 }
 0x2b4   :  { %242 = vst.msk [vmem:[%s1408_s9] sm:$0xff] %vm241_vm7, %v236_v46 }
 0x2bc   :  { %v255_v47 = vpop.permute.xlu1 %254 }
 0x2bd   :  { %v264_v59 = vmul.f32 %v969_v58, %v255_v47 }
 0x2bf   :  { %v268_v63 = vmul.f32 %v266_v61, %v264_v59 }
 0x2c0   :  { %v280_v48 = vpop.permute.xlu1 %279 }
 0x2c1   :  { %1074 = vmatmul.mubr.msk.f32.vlgmr.msra.gmra.mrb[2].mxu1 %vm281_vm5, %v280_v48 }
 0x2c2   :  { %1164 = vmatpush3.bf16.msra.mxu1 %v1161_v54 }
 0x2c3   :  { %1172 = vmatprep.subr.bf16.mxu1 %v1171_v57 }
 0x2c4   :  { %v618_v49 = vpop.permute.xlu1 %617 }
 0x2c8   :  { %v786_v50 = vpop.permute.xlu1 %785 }
 0x2cc   :  { %v238_v51 = vpop.permute.xlu1 %237 }
 0x2cd   :  { %243 = vst.msk [vmem:[%s1408_s9 + $0x8] sm:$0xff] %vm241_vm7, %v238_v51 }
 0x37f   :  { %v1082_v1 = vpop.f32.mrb[2].mxu0 }
 0x380   :  { %v441_v2 = vpop.f32.mrb[3].mxu0  ;;  %v451_v4 = vmul.f32 %v1082_v1, %v268_v63 }
 0x381   :  { %v450_v3 = vmul.f32 %v441_v2, %v267_v0 }
 0x383   :  { %1087 = vmatprep.mubr.msk.f32.mxu0 %vm452_vm8, %v450_v3 }
 0x384   :  { %1088 = vmatmul.mubr.msk.f32.vlgmr.msra.gmra.mrb[4].mxu0 %vm452_vm8, %v451_v4 }
 0x385   :  { %1170 = vmatpush3.bf16.xpose.msk.msra.mxu0 %vm1312_vm6, %v1316_v37  ;;  %1101 = vmatprep.mubr.msk.f32.mxu0 %vm281_vm5, %v616_v44 }
 0x38c   :  { %1102 = vmatmul.mubr.msk.f32.vlgmr.msra.gmra.mrb[6].mxu0 %vm281_vm5, %v618_v49 }
 0x394   :  { %v1075_v5 = vpop.f32.mrb[2].mxu1 }
 0x395   :  { %v356_v6 = vpop.f32.mrb[3].mxu1  ;;  %v366_v8 = vmul.f32 %v1075_v5, %v268_v63 }
 0x396   :  { %v365_v7 = vmul.f32 %v356_v6, %v267_v0 }
 0x398   :  { %1094 = vmatprep.mubr.msk.f32.mxu1 %vm452_vm8, %v365_v7 }
 0x399   :  { %1095 = vmatmul.mubr.msk.f32.vlgmr.msra.gmra.mrb[4].mxu1 %vm452_vm8, %v366_v8 }
 0x39a   :  { %1174 = vmatpush3.bf16.msra.mxu1 %v1171_v57 }
 0x39b   :  { %1177 = vmatprep.subr.msk.bf16.mxu1 %vm1312_vm6, %v1316_v37 }
 0x457   :  { %v1089_v9 = vpop.f32.mrb[4].mxu0 }
 0x458   :  { %v525_v10 = vpop.f32.mrb[5].mxu0 }
 0x45f   :  { %v1103_v11 = vpop.f32.mrb[6].mxu0 }
 0x460   :  { %v689_v12 = vpop.f32.mrb[7].mxu0  ;;  %v699_v14 = vmul.f32 %v1103_v11, %v268_v63 }
 0x461   :  { %v698_v13 = vmul.f32 %v689_v12, %v267_v0 }
 0x463   :  { %1108 = vmatprep.mubr.msk.f32.mxu1 %vm452_vm8, %v698_v13 }
 0x464   :  { %1109 = vmatmul.mubr.msk.f32.vlgmr.msra.gmra.mrb[4].mxu1 %vm452_vm8, %v699_v14 }
 0x465   :  { %1180 = vmatpush3.bf16.xpose.msk.msra.mxu1 %vm1312_vm6, %v1316_v37  ;;  %1115 = vmatprep.mubr.msk.f32.mxu1 %vm281_vm5, %v784_v45 }
 0x466   :  { %1182 = vmatprep.subr.bf16.mxu1 %v1181_v17 }
 0x46c   :  { %1116 = vmatmul.mubr.msk.f32.vlgmr.msra.gmra.mrb[6].mxu1 %vm281_vm5, %v786_v50 }
 0x46d   :  { %1184 = vmatpush3.bf16.msra.mxu1 %v1181_v17 }
 0x53f   :  { %v1117_v18 = vpop.f32.mrb[6].mxu1 }
 0x540   :  { %v857_v19 = vpop.f32.mrb[7].mxu1  ;;  %v867_v21 = vmul.f32 %v1117_v18, %v268_v63 }
 0x541   :  { %v866_v20 = vmul.f32 %v857_v19, %v267_v0 }
 0x543   :  { %1122 = vmatprep.mubr.msk.f32.mxu1 %vm452_vm8, %v866_v20 }
 0x544   :  { %1123 = vmatmul.mubr.msk.f32.vlgmr.msra.gmra.mrb[4].mxu1 %vm452_vm8, %v867_v21 }
 0x617   :  { %v1124_v22 = vpop.f32.mrb[4].mxu1 }
 0x618   :  { %v1185_v23 = vadd.f32 %v1124_v22, %v1089_v9  ;;  %v940_v24 = vpop.f32.mrb[5].mxu1 }
 0x619   :  { %v1186_v25 = vadd.f32 %v940_v24, %v525_v10 }
 0x61a   :  { %952 = vst.msk [vmem:[%s1411_s8 + $0x8] sm:$0xff] %vm151_vm4, %v1185_v23 }
 0x61b   :  { %951 = vst.msk [vmem:[%s1411_s8] sm:$0xff] %vm151_vm4, %v1186_v25 }

</bundles_post_ra>
